<compile_context>
chip_gen: v5e
topology: v5e:2x2
jax: 0.10.0
libtpu: 0.0.40
codegen_flags: <defaults>
</compile_context>

<pallas_src>
import jax
import jax.numpy as jnp
from jax.experimental import pallas as pl
from jax.experimental.pallas import tpu as pltpu


def _vmem_capacity_bytes():
    """Per-TensorCore VMEM of the attached part (conservative fallback)."""
    try:
        kind = jax.devices()[0].device_kind.lower()
    except Exception:
        return 64 * 1024 * 1024
    if "v7" in kind:
        return 64 * 1024 * 1024        # v7x: 64 MiB per TC
    return 128 * 1024 * 1024           # v5e / v6e: 128 MiB


def _choose_tn(H, B, w_itemsize, tn=None):
    """Output-feature tile size.

    Lane-dense (multiple of 128) whenever H allows; sized so the
    double-buffered (tn, H) weight stream fits ~a quarter of the detected
    VMEM (fewer, bigger grid steps -> less per-step fixed overhead on
    128 MiB parts) and so the f32 (B, tn) epilogue tile stays under
    ~128 KiB of vregs (spill guard for large B)."""
    if tn is not None:
        assert H % tn == 0, "explicit tn must divide H"
        assert tn % 128 == 0 or tn == H, (
            "explicit tn must be a multiple of 128 or equal to H "
            "(lowering-legal output/bias block)")
        return tn
    if H % 128 != 0:
        return H   # tiny non-aligned H: single full-width block (masked stores)
    weight_budget = _vmem_capacity_bytes() // 4        # 2x (tn, H) weight buffers
    vreg_budget = 128 * 1024                           # ~half the 256 KiB vreg file
    tn_vreg_cap = max(128, (vreg_budget // (4 * B)) // 128 * 128)
    best = 128
    for t in range(128, H + 1, 128):
        if H % t != 0:
            continue
        if 2 * t * H * w_itemsize > weight_budget:
            continue
        if t > tn_vreg_cap:
            continue
        best = t
    return best


def _make_pooler_kernel(tn):
    def kernel(hs_ref, w_ref, b_ref, o_ref, xbuf, copy_sem):
        # hs_ref: (B, S, H) raw HBM ref (ANY)
        # w_ref : (tn, H)   streamed weight tile, PyTorch (out, in) layout
        # b_ref : (1, H)    resident bias
        # o_ref : (B, tn)   output tile
        # xbuf  : (B, 1, H) resident first-token scratch (VMEM)
        j = pl.program_id(0)

        # One-time first-token gather: a single strided DMA of the B
        # [:, 0, :] rows from HBM into the resident scratch.  Grid axis is
        # "arbitrary" (sequential), so the j == 0 prologue runs first.
        @pl.when(j == 0)
        def _():
            cp = pltpu.make_async_copy(
                hs_ref.at[:, pl.ds(0, 1), :], xbuf, copy_sem)
            cp.start()
            cp.wait()

        x = xbuf[...][:, 0, :]                  # (B, H) first-token activations
        w = w_ref[...]                          # (tn, H)
        if x.dtype != w.dtype:
            x = x.astype(w.dtype)               # keep MXU operand dtypes matched

        # y[b, n] = sum_h x[b, h] * w[n, h]  ==  (x @ W.T) tile.
        # Contracting the lane dim of both operands keeps the PyTorch weight
        # layout (no HBM transpose pass); accumulation in f32 on the MXU.
        y = jax.lax.dot_general(
            x, w,
            dimension_numbers=(((1,), (1,)), ((), ())),
            preferred_element_type=jnp.float32,
        )

        # Bias is resident as one (1, H) block; slice this tile's columns.
        col0 = pl.multiple_of(j * tn, tn)
        y = y + b_ref[:, pl.ds(col0, tn)].astype(jnp.float32)

        o_ref[...] = jnp.tanh(y).astype(o_ref.dtype)

    return kernel


def text_pooler(hidden_states, weight, bias, *, tn=None):
    """hidden_states: (B, S, H); weight: (H, H) PyTorch Linear weight
    (out_features, in_features); bias: (H,).

    Returns tanh(hidden_states[:, 0] @ weight.T + bias) with the dtype of
    hidden_states.  For best performance persist `weight`/`bias` in bf16 at
    the model level (do NOT cast per call): the kernel is memory-bound on the
    H*H weight read; accumulation/bias/tanh stay f32 inside the kernel."""
    B, S, H = hidden_states.shape
    assert weight.shape == (H, H) and bias.shape == (H,)

    out_dtype = hidden_states.dtype
    x_dtype = hidden_states.dtype
    w_itemsize = jnp.dtype(weight.dtype).itemsize
    bias2d = bias.reshape(1, H)                 # metadata-only reshape

    tn = _choose_tn(H, B, w_itemsize, tn)
    grid = (H // tn,)

    # VMEM footprint: double-buffered weight tiles + resident bias + output
    # tiles + resident first-token scratch (each (1, H) row pads to 8 sublanes).
    footprint = (
        2 * tn * H * w_itemsize
        + 2 * H * jnp.dtype(bias.dtype).itemsize
        + 2 * B * tn * jnp.dtype(out_dtype).itemsize
        + B * 8 * H * jnp.dtype(x_dtype).itemsize
    )
    vmem_limit = int(min(_vmem_capacity_bytes(),
                         max(2 * footprint, 32 * 1024 * 1024)))

    cost = pl.CostEstimate(
        flops=2 * B * H * H,
        transcendentals=B * H,                  # tanh
        bytes_accessed=(
            B * H * jnp.dtype(x_dtype).itemsize            # first-token rows
            + weight.size * w_itemsize                     # dominant term
            + bias.size * jnp.dtype(bias.dtype).itemsize
            + B * H * jnp.dtype(out_dtype).itemsize
        ),
    )

    return pl.pallas_call(
        _make_pooler_kernel(tn),
        out_shape=jax.ShapeDtypeStruct((B, H), out_dtype),
        grid_spec=pltpu.PrefetchScalarGridSpec(
            num_scalar_prefetch=0,
            grid=grid,
            in_specs=[
                # hidden_states stays in HBM; only the B first-token rows are
                # DMA'd by the kernel (fused gather).
                pl.BlockSpec(memory_space=pl.ANY),
                # W: stream (tn, H) row-tiles of the (out, in) layout weight.
                pl.BlockSpec((tn, H), lambda j: (j, 0)),
                # bias: single resident (1, H) block (constant block index).
                pl.BlockSpec((1, H), lambda j: (0, 0)),
            ],
            out_specs=pl.BlockSpec((B, tn), lambda j: (0, j)),
            scratch_shapes=[
                pltpu.VMEM((B, 1, H), x_dtype),   # resident first-token rows
                pltpu.SemaphoreType.DMA,          # gather-DMA completion
            ],
        ),
        compiler_params=pltpu.CompilerParams(
            # "arbitrary": sequential grid order makes the j == 0 gather
            # prologue safe; plain "parallel" doesn't change codegen anyway.
            dimension_semantics=("arbitrary",),
            vmem_limit_bytes=vmem_limit,
        ),
        cost_estimate=cost,
    )(hidden_states, weight, bias2d)


if __name__ == "__main__":
    key = jax.random.PRNGKey(0)
    k_x, k_w, k_b = jax.random.split(key, 3)

    # Representative (lane-aligned) small config.
    B, S, H = 4, 8, 256
    hidden_states = jax.random.normal(k_x, (B, S, H), dtype=jnp.float32)
    bound = 1.0 / (H ** 0.5)
    weight = jax.random.uniform(k_w, (H, H), minval=-bound, maxval=bound,
                                dtype=jnp.float32)
    bias = jax.random.uniform(k_b, (H,), minval=-bound, maxval=bound,
                              dtype=jnp.float32)

    ref = jnp.tanh(hidden_states[:, 0] @ weight.T + bias)

    # Default auto-tiling (grid=(1,) at this size: whole weight in one tile).
    out = jax.block_until_ready(text_pooler(hidden_states, weight, bias))
    assert out.shape == (B, H) and out.dtype == hidden_states.dtype
    assert jnp.allclose(out, ref, atol=1e-5, rtol=1e-5)

    # Forced tn=128 -> grid=(2,): exercises the streamed weight path, the
    # resident-bias dynamic slice and the gather prologue across steps.
    out_tiled = jax.block_until_ready(text_pooler(hidden_states, weight, bias, tn=128))
    assert jnp.allclose(out_tiled, ref, atol=1e-5, rtol=1e-5)

    # bf16 storage path (recommended default: weights persisted as bf16 at the
    # model level; f32 accumulation + tanh inside the kernel).
    out_bf16 = jax.block_until_ready(
        text_pooler(hidden_states.astype(jnp.bfloat16),
                    weight.astype(jnp.bfloat16),
                    bias.astype(jnp.bfloat16), tn=128))
    assert out_bf16.dtype == jnp.bfloat16
    assert jnp.allclose(out_bf16.astype(jnp.float32), ref, atol=3e-2, rtol=3e-2)

    # Tiny, non-128-aligned H falls back to a single full-width block.
    B2, H2 = 2, 32
    hs2 = jax.random.normal(k_x, (B2, S, H2), dtype=jnp.float32)
    bound2 = 1.0 / (H2 ** 0.5)
    w2 = jax.random.uniform(k_w, (H2, H2), minval=-bound2, maxval=bound2,
                            dtype=jnp.float32)
    b2 = jax.random.uniform(k_b, (H2,), minval=-bound2, maxval=bound2,
                            dtype=jnp.float32)
    out2 = jax.block_until_ready(text_pooler(hs2, w2, b2))
    ref2 = jnp.tanh(hs2[:, 0] @ w2.T + b2)
    assert jnp.allclose(out2, ref2, atol=1e-5, rtol=1e-5)

    print("KERNEL_OK")
</pallas_src>

<mosaic_0001>
module attributes {stable_mosaic.version = 11 : i64} {
  func.func @kernel(%arg0: i32, %arg1: memref<4x8x256xf32, #tpu.memory_space<any>>, %arg2: memref<256x256xf32, #tpu.memory_space<vmem>>, %arg3: memref<1x256xf32, #tpu.memory_space<vmem>>, %arg4: memref<4x256xf32, #tpu.memory_space<vmem>>, %arg5: memref<4x1x256xf32, #tpu.memory_space<vmem>>, %arg6: memref<!tpu.dma_semaphore, #tpu.memory_space<semaphore_mem>>) attributes {dimension_semantics = [#tpu.dimension_semantics<arbitrary>], iteration_bounds = array<i64: 1>, scalar_prefetch = 0 : i64, scratch_operands = 2 : i64, tpu.core_type = #tpu.core_type<tc>, window_params = [{}, {transform_indices = @transform_1, window_bounds = array<i64: 256, 256>}, {pipeline_mode = #tpu.pipeline_mode<synchronous>, transform_indices = @transform_2, window_bounds = array<i64: 1, 256>}, {transform_indices = @transform_3, window_bounds = array<i64: 4, 256>}]} {
    %c0_i32 = arith.constant 0 : i32
    %0 = arith.cmpi eq, %arg0, %c0_i32 : i32
    %1 = arith.extui %0 : i1 to i32
    %c0_i32_0 = arith.constant 0 : i32
    %2 = arith.cmpi ne, %1, %c0_i32_0 : i32
    scf.if %2 {
      %c0_i32_8 = arith.constant 0 : i32
      %c0_i32_9 = arith.constant 0 : i32
      %c0_i32_10 = arith.constant 0 : i32
      %15 = tpu.memref_slice %arg1[%c0_i32_8, %c0_i32_9, %c0_i32_10] : memref<4x8x256xf32, #tpu.memory_space<any>> -> memref<4x1x256xf32, #tpu.memory_space<any>>
      tpu.enqueue_dma source(%15 : memref<4x1x256xf32, #tpu.memory_space<any>>) target(%arg5 : memref<4x1x256xf32, #tpu.memory_space<vmem>>) target_semaphore(%arg6 : memref<!tpu.dma_semaphore, #tpu.memory_space<semaphore_mem>>)
      %c0_i32_11 = arith.constant 0 : i32
      %c0_i32_12 = arith.constant 0 : i32
      %c0_i32_13 = arith.constant 0 : i32
      %16 = tpu.memref_slice %arg1[%c0_i32_11, %c0_i32_12, %c0_i32_13] : memref<4x8x256xf32, #tpu.memory_space<any>> -> memref<4x1x256xf32, #tpu.memory_space<any>>
      tpu.wait_dma2 semaphore(%arg6 : memref<!tpu.dma_semaphore, #tpu.memory_space<semaphore_mem>>) src(%16 : memref<4x1x256xf32, #tpu.memory_space<any>>) dst(%arg5 : memref<4x1x256xf32, #tpu.memory_space<vmem>>)
    } else {
    }
    %c0 = arith.constant 0 : index
    %c0_1 = arith.constant 0 : index
    %c0_2 = arith.constant 0 : index
    %3 = vector.load %arg5[%c0, %c0_1, %c0_2] : memref<4x1x256xf32, #tpu.memory_space<vmem>>, vector<4x1x256xf32>
    %4 = vector.shape_cast %3 : vector<4x1x256xf32> to vector<4x256xf32>
    %c0_3 = arith.constant 0 : index
    %c0_4 = arith.constant 0 : index
    %5 = vector.load %arg2[%c0_3, %c0_4] : memref<256x256xf32, #tpu.memory_space<vmem>>, vector<256x256xf32>
    %cst = arith.constant dense<0.000000e+00> : vector<4x256xf32>
    %6 = tpu.matmul %4, %5, %cst {dimension_numbers = #tpu.dot_dimension_numbers<[1], [1], [0], [0], [0, 0, 1, 0], [], []>} : vector<4x256xf32>, vector<256x256xf32>, vector<4x256xf32> -> vector<4x256xf32>
    %c256_i32 = arith.constant 256 : i32
    %7 = arith.muli %arg0, %c256_i32 : i32
    %8 = tpu.assume_multiple %7, 256 : i32
    %c0_5 = arith.constant 0 : index
    %9 = arith.index_cast %8 : i32 to index
    %10 = vector.load %arg3[%c0_5, %9] : memref<1x256xf32, #tpu.memory_space<vmem>>, vector<1x256xf32>
    %11 = vector.broadcast %10 : vector<1x256xf32> to vector<4x256xf32>
    %12 = arith.addf %6, %11 : vector<4x256xf32>
    %13 = math.tanh %12 : vector<4x256xf32>
    %c0_6 = arith.constant 0 : index
    %c0_7 = arith.constant 0 : index
    %14 = vector.load %arg4[%c0_6, %c0_7] : memref<4x256xf32, #tpu.memory_space<vmem>>, vector<4x256xf32>
    tpu.vector_store %arg4[%c0_6, %c0_7], %13 {strides = array<i32>} : memref<4x256xf32, #tpu.memory_space<vmem>>, vector<4x256xf32>,
    return
  }
  func.func @transform_1(%arg0: i32) -> (i32, i32) {
    %c0_i32 = arith.constant 0 : i32
    %c0_i32_0 = arith.constant 0 : i32
    return %arg0, %c0_i32 : i32, i32
  }
  func.func @transform_2(%arg0: i32) -> (i32, i32) {
    %c0_i32 = arith.constant 0 : i32
    %c0_i32_0 = arith.constant 0 : i32
    %c0_i32_1 = arith.constant 0 : i32
    return %c0_i32, %c0_i32_0 : i32, i32
  }
  func.func @transform_3(%arg0: i32) -> (i32, i32) {
    %c0_i32 = arith.constant 0 : i32
    %c0_i32_0 = arith.constant 0 : i32
    return %c0_i32, %arg0 : i32, i32
  }
}

</mosaic_0001>

<bundles_post_ra>
// kernel: tpu_custom_call.1
= control target key start
LH: loop header
LB: loop body
LE: loop exit
PB: predicated region body
PF: predicated region fallthrough
CT: control target
= control target key end

     0   :  { %8 = vsyncpa [#allocation5], 0  ;;  %s423_s0 = inlined_call_operand.hbm [shape: f32[4,8,256], index: 0, kind: input, shape index: {}]   ;;  %s424_s1 = inlined_call_operand.hbm [shape: f32[256,256], index: 1, kind: input, shape index: {}]   ;;  %s425_s2 = inlined_call_operand.hbm [shape: f32[1,256], index: 2, kind: input, shape index: {}]   ;;  %s426_s3 = inlined_call_operand.hbm [shape: f32[4,256], index: 3, kind: output, shape index: {}]  }
   0x1   :  { %9 = vsyncpa [#allocation8], 0 }
   0x2   :  { %10 = vsyncpa [#allocation6], 0  ;;  %s15_s14 = sshll.u32 %s424_s1, 4  ;;  %s383_s15 = smov [#allocation4]   ;;  %s16_s14 = int_to_ptr.hbm [resolvable:$true] %s15_s14 }
   0x3   :  { %s17_s16 = sshll.u32 %s383_s15, 4  ;;  %s29_s19 = sshll.u32 %s425_s2, 4  ;;  %s18_s16 = int_to_ptr.vmem [resolvable:$true] %s17_s16  ;;  %s30_s19 = int_to_ptr.hbm [resolvable:$true] %s29_s19 }
   0x4   :  { %s384_s20 = smov 256   ;;  %s385_s21 = smov 16  }
   0x5   :  { %23 = dma.hbm_to_vmem [thread:$0]  %s16_s14, 8192, %s18_s16, [#allocation5], %s384_s20, %s384_s20, %s385_s21  }
   0x6   :  { %s386_s22 = smov [#allocation7]  }
   0x7   :  { %s31_s23 = sshll.u32 %s386_s22, 4  ;;  %s32_s23 = int_to_ptr.vmem [resolvable:$true] %s31_s23 }
   0x8   :  { %34 = dma.hbm_to_vmem [thread:$0]  %s30_s19, 32, %s32_s23, [#allocation8]  }
   0x9   :  { %375 = dma.done.wait [#allocation5], 8192  }
   0xa   :  { %376 = vsyncadd [#allocation5], 4294959104 }
   0xb   :  { %377 = dma.done.wait [#allocation8], 32  }
   0xc   :  { %378 = vsyncadd [#allocation8], 4294967264  ;;  %s47_s25 = sshll.u32 %s423_s0, 4  ;;  %s387_s26 = smov [#allocation2]   ;;  %s48_s25 = int_to_ptr.hbm [resolvable:$true] %s47_s25 }
   0xd   :  { %s49_s27 = sshll.u32 %s387_s26, 4  ;;  %s388_s2 = smov 128   ;;  %s50_s27 = int_to_ptr.vmem [resolvable:$true] %s49_s27 }
   0xe   :  { %s389_s28 = smov 1  }
   0xf   :  { %54 = dma.hbm_to_vmem [thread:$0]  %s48_s25, 128, %s50_s27, [#allocation3], %s388_s2, %s385_s21, %s389_s28 }
  0x10   :  { %379 = dma.done.wait [#allocation3], 128 }
  0x11   :  { %380 = vsyncadd [#allocation3], 4294967168  ;;  %v125_v0 = vld [vmem:[#allocation4 + $0x1f0] sm:$0xff]  ;;  %v126_v1 = vld [vmem:[#allocation4 + $0x1f8] sm:$0xff]  ;;  %s390_s0 = smov [#allocation9]   ;;  %s248_s5 = sshll.u32 %s426_s3, 4  ;;  %s249_s5 = int_to_ptr.hbm [resolvable:$true] %s248_s5 }
  0x12   :  { %192 = vmatpush.xpose.msra.mxu2 %v125_v0  ;;  %212 = vmatpush.xpose.msra.mxu3 %v126_v1  ;;  %v93_v2 = vld [vmem:[#allocation4 + $0xf0] sm:$0xff]  ;;  %v123_v3 = vld [vmem:[#allocation4 + $0x1e0] sm:$0xff]  ;;  %v124_v4 = vld [vmem:[#allocation4 + $0x1e8] sm:$0xff]  ;;  %s246_s29 = sshll.u32 %s390_s0, 4  ;;  %vm237_vm0 = vcmask 1043456   ;;  %s247_s29 = int_to_ptr.vmem [resolvable:$true] %s246_s29 }
  0x13   :  { %152 = vmatpush.xpose.msra.mxu0 %v93_v2  ;;  %v94_v5 = vld [vmem:[#allocation4 + $0xf8] sm:$0xff]  ;;  %v91_v6 = vld [vmem:[#allocation4 + $0xe0] sm:$0xff]  ;;  %v92_v7 = vld [vmem:[#allocation4 + $0xe8] sm:$0xff] }
  0x14   :  { %172 = vmatpush.xpose.msra.mxu1 %v94_v5  ;;  %v121_v8 = vld [vmem:[#allocation4 + $0x1d0] sm:$0xff]  ;;  %v122_v9 = vld [vmem:[#allocation4 + $0x1d8] sm:$0xff]  ;;  %v119_v12 = vld [vmem:[#allocation4 + $0x1c0] sm:$0xff] }
  0x15   :  { %v89_v10 = vld [vmem:[#allocation4 + $0xd0] sm:$0xff]  ;;  %v90_v11 = vld [vmem:[#allocation4 + $0xd8] sm:$0xff]  ;;  %v120_v13 = vld [vmem:[#allocation4 + $0x1c8] sm:$0xff] }
  0x16   :  { %193 = vmatpush.xpose.msra.mxu2 %v123_v3  ;;  %213 = vmatpush.xpose.msra.mxu3 %v124_v4  ;;  %v87_v14 = vld [vmem:[#allocation4 + $0xc0] sm:$0xff]  ;;  %v88_v15 = vld [vmem:[#allocation4 + $0xc8] sm:$0xff]  ;;  %v117_v16 = vld [vmem:[#allocation4 + $0x1b0] sm:$0xff] }
  0x17   :  { %153 = vmatpush.xpose.msra.mxu0 %v91_v6  ;;  %v118_v17 = vld [vmem:[#allocation4 + $0x1b8] sm:$0xff]  ;;  %v85_v18 = vld [vmem:[#allocation4 + $0xb0] sm:$0xff]  ;;  %v115_v20 = vld [vmem:[#allocation4 + $0x1a0] sm:$0xff] }
  0x18   :  { %173 = vmatpush.xpose.msra.mxu1 %v92_v7  ;;  %v86_v19 = vld [vmem:[#allocation4 + $0xb8] sm:$0xff]  ;;  %v116_v21 = vld [vmem:[#allocation4 + $0x1a8] sm:$0xff]  ;;  %v83_v22 = vld [vmem:[#allocation4 + $0xa0] sm:$0xff] }
  0x19   :  { %v84_v23 = vld [vmem:[#allocation4 + $0xa8] sm:$0xff]  ;;  %v113_v24 = vld [vmem:[#allocation4 + $0x190] sm:$0xff]  ;;  %v114_v25 = vld [vmem:[#allocation4 + $0x198] sm:$0xff] }
  0x1a   :  { %194 = vmatpush.xpose.msra.mxu2 %v121_v8  ;;  %214 = vmatpush.xpose.msra.mxu3 %v122_v9  ;;  %v81_v26 = vld [vmem:[#allocation4 + $0x90] sm:$0xff]  ;;  %v59_v27 = vld [vmem:[#allocation2] sm:$0x3]  ;;  %v60_v28 = vld [vmem:[#allocation2 + $0x2] sm:$0x3] }
  0x1b   :  { %154 = vmatpush.xpose.msra.mxu0 %v89_v10  ;;  %v61_v29 = vld [vmem:[#allocation2 + $0x4] sm:$0x3]  ;;  %v62_v31 = vld [vmem:[#allocation2 + $0x6] sm:$0x3]  ;;  %141 = vst [vmem:[#allocation1] ss:$9 sm:$0xff] %v59_v27 }
  0x1c   :  { %174 = vmatpush.xpose.msra.mxu1 %v90_v11  ;;  %v82_v30 = vld [vmem:[#allocation4 + $0x98] sm:$0xff]  ;;  %143 = vst [vmem:[#allocation1 + $0x1] ss:$9 sm:$0xff] %v60_v28  ;;  %v111_v32 = vld [vmem:[#allocation4 + $0x180] sm:$0xff]  ;;  %v112_v33 = vld [vmem:[#allocation4 + $0x188] sm:$0xff] }
  0x1d   :  { %145 = vst [vmem:[#allocation1 + $0x2] ss:$9 sm:$0xff] %v61_v29  ;;  %v79_v34 = vld [vmem:[#allocation4 + $0x80] sm:$0xff]  ;;  %v80_v35 = vld [vmem:[#allocation4 + $0x88] sm:$0xff]  ;;  %v109_v36 = vld [vmem:[#allocation4 + $0x170] sm:$0xff] }
  0x1e   :  { %195 = vmatpush.xpose.msra.mxu2 %v119_v12  ;;  %215 = vmatpush.xpose.msra.mxu3 %v120_v13  ;;  %147 = vst [vmem:[#allocation1 + $0x3] ss:$9 sm:$0xff] %v62_v31  ;;  %v110_v37 = vld [vmem:[#allocation4 + $0x178] sm:$0xff]  ;;  %v77_v38 = vld [vmem:[#allocation4 + $0x70] sm:$0xff]  ;;  %v107_v40 = vld [vmem:[#allocation4 + $0x160] sm:$0xff] }
  0x1f   :  { %155 = vmatpush.xpose.msra.mxu0 %v87_v14  ;;  %v78_v39 = vld [vmem:[#allocation4 + $0x78] sm:$0xff]  ;;  %v108_v41 = vld [vmem:[#allocation4 + $0x168] sm:$0xff]  ;;  %v75_v42 = vld [vmem:[#allocation4 + $0x60] sm:$0xff] }
  0x20   :  { %175 = vmatpush.xpose.msra.mxu1 %v88_v15  ;;  %v76_v43 = vld [vmem:[#allocation4 + $0x68] sm:$0xff]  ;;  %v105_v44 = vld [vmem:[#allocation4 + $0x150] sm:$0xff]  ;;  %v106_v45 = vld [vmem:[#allocation4 + $0x158] sm:$0xff] }
  0x21   :  { %v73_v46 = vld [vmem:[#allocation4 + $0x50] sm:$0xff]  ;;  %v74_v47 = vld [vmem:[#allocation4 + $0x58] sm:$0xff]  ;;  %v103_v48 = vld [vmem:[#allocation4 + $0x140] sm:$0xff] }
  0x22   :  { %196 = vmatpush.xpose.msra.mxu2 %v117_v16  ;;  %216 = vmatpush.xpose.msra.mxu3 %v118_v17  ;;  %v104_v49 = vld [vmem:[#allocation4 + $0x148] sm:$0xff]  ;;  %v71_v50 = vld [vmem:[#allocation4 + $0x40] sm:$0xff]  ;;  %v101_v52 = vld [vmem:[#allocation4 + $0x130] sm:$0xff] }
  0x23   :  { %156 = vmatpush.xpose.msra.mxu0 %v85_v18  ;;  %v72_v51 = vld [vmem:[#allocation4 + $0x48] sm:$0xff]  ;;  %v102_v53 = vld [vmem:[#allocation4 + $0x138] sm:$0xff]  ;;  %v69_v54 = vld [vmem:[#allocation4 + $0x30] sm:$0xff] }
  0x24   :  { %176 = vmatpush.xpose.msra.mxu1 %v86_v19  ;;  %v70_v55 = vld [vmem:[#allocation4 + $0x38] sm:$0xff]  ;;  %v99_v56 = vld [vmem:[#allocation4 + $0x120] sm:$0xff]  ;;  %v100_v57 = vld [vmem:[#allocation4 + $0x128] sm:$0xff] }
  0x25   :  { %v67_v58 = vld [vmem:[#allocation4 + $0x20] sm:$0xff]  ;;  %v68_v59 = vld [vmem:[#allocation4 + $0x28] sm:$0xff]  ;;  %v97_v60 = vld [vmem:[#allocation4 + $0x110] sm:$0xff] }
  0x26   :  { %197 = vmatpush.xpose.msra.mxu2 %v115_v20  ;;  %217 = vmatpush.xpose.msra.mxu3 %v116_v21  ;;  %v98_v61 = vld [vmem:[#allocation4 + $0x118] sm:$0xff]  ;;  %v65_v62 = vld [vmem:[#allocation4 + $0x10] sm:$0xff]  ;;  %v95_v0 = vld [vmem:[#allocation4 + $0x100] sm:$0xff] }
  0x27   :  { %157 = vmatpush.xpose.msra.mxu0 %v83_v22  ;;  %v66_v63 = vld [vmem:[#allocation4 + $0x18] sm:$0xff]  ;;  %v96_v1 = vld [vmem:[#allocation4 + $0x108] sm:$0xff]  ;;  %v63_v2 = vld [vmem:[#allocation4] sm:$0xff] }
  0x28   :  { %177 = vmatpush.xpose.msra.mxu1 %v84_v23  ;;  %v64_v3 = vld [vmem:[#allocation4 + $0x8] sm:$0xff]  ;;  %v148_v4 = vld [vmem:[#allocation1] sm:$0xff]  ;;  %v149_v5 = vld [vmem:[#allocation1 + $0x9] sm:$0xff] }
  0x29   :  { %v131_v6 = vld [vmem:[#allocation7] sm:$0x3] }
  0x2a   :  { %198 = vmatpush.xpose.msra.mxu2 %v113_v24  ;;  %218 = vmatpush.xpose.msra.mxu3 %v114_v25  ;;  %v133_v7 = vperm.slane %v131_v6, 0  ;;  %v134_v10 = vperm.slane %v131_v6, 1 }
  0x2b   :  { %158 = vmatpush.xpose.msra.mxu0 %v81_v26 }
  0x2c   :  { %178 = vmatpush.xpose.msra.mxu1 %v82_v30 }
  0x2e   :  { %199 = vmatpush.xpose.msra.mxu2 %v111_v32  ;;  %219 = vmatpush.xpose.msra.mxu3 %v112_v33 }
  0x2f   :  { %159 = vmatpush.xpose.msra.mxu0 %v79_v34 }
  0x30   :  { %179 = vmatpush.xpose.msra.mxu1 %v80_v35 }
  0x32   :  { %200 = vmatpush.xpose.msra.mxu2 %v109_v36  ;;  %220 = vmatpush.xpose.msra.mxu3 %v110_v37 }
  0x33   :  { %160 = vmatpush.xpose.msra.mxu0 %v77_v38 }
  0x34   :  { %180 = vmatpush.xpose.msra.mxu1 %v78_v39 }
  0x36   :  { %201 = vmatpush.xpose.msra.mxu2 %v107_v40  ;;  %221 = vmatpush.xpose.msra.mxu3 %v108_v41 }
  0x37   :  { %161 = vmatpush.xpose.msra.mxu0 %v75_v42 }
  0x38   :  { %181 = vmatpush.xpose.msra.mxu1 %v76_v43 }
  0x3a   :  { %202 = vmatpush.xpose.msra.mxu2 %v105_v44  ;;  %222 = vmatpush.xpose.msra.mxu3 %v106_v45 }
  0x3b   :  { %162 = vmatpush.xpose.msra.mxu0 %v73_v46 }
  0x3c   :  { %182 = vmatpush.xpose.msra.mxu1 %v74_v47 }
  0x3e   :  { %203 = vmatpush.xpose.msra.mxu2 %v103_v48  ;;  %223 = vmatpush.xpose.msra.mxu3 %v104_v49 }
  0x3f   :  { %163 = vmatpush.xpose.msra.mxu0 %v71_v50 }
  0x40   :  { %183 = vmatpush.xpose.msra.mxu1 %v72_v51 }
  0x42   :  { %204 = vmatpush.xpose.msra.mxu2 %v101_v52  ;;  %224 = vmatpush.xpose.msra.mxu3 %v102_v53 }
  0x43   :  { %164 = vmatpush.xpose.msra.mxu0 %v69_v54 }
  0x44   :  { %184 = vmatpush.xpose.msra.mxu1 %v70_v55 }
  0x46   :  { %205 = vmatpush.xpose.msra.mxu2 %v99_v56  ;;  %225 = vmatpush.xpose.msra.mxu3 %v100_v57 }
  0x47   :  { %165 = vmatpush.xpose.msra.mxu0 %v67_v58 }
  0x48   :  { %185 = vmatpush.xpose.msra.mxu1 %v68_v59 }
  0x4a   :  { %206 = vmatpush.xpose.msra.mxu2 %v97_v60  ;;  %226 = vmatpush.xpose.msra.mxu3 %v98_v61 }
  0x4b   :  { %166 = vmatpush.xpose.msra.mxu0 %v65_v62 }
  0x4c   :  { %186 = vmatpush.xpose.msra.mxu1 %v66_v63 }
  0x4e   :  { %207 = vmatpush.xpose.msra.mxu2 %v95_v0  ;;  %227 = vmatpush.xpose.msra.mxu3 %v96_v1 }
  0x4f   :  { %167 = vmatpush.xpose.msra.mxu0 %v63_v2 }
  0x50   :  { %187 = vmatpush.xpose.msra.mxu1 %v64_v3 }
  0x51   :  { %208 = vmatmul.f32.vlgmr.msra.gmra.mxu2 %v148_v4  ;;  %228 = vmatmul.f32.vlgmr.msra.gmra.mxu3 %v149_v5 }
  0x52   :  { %168 = vmatmul.f32.vlgmr.msra.gmra.mxu0 %v148_v4 }
  0x53   :  { %188 = vmatmul.f32.vlgmr.msra.gmra.mxu1 %v149_v5 }
  0xcf   :  { %v169_v8 = vpop.f32.mrf.mxu0 }
  0xd0   :  { %v170_v9 = vadd.f32 %v169_v8, %v133_v7  ;;  %v189_v11 = vpop.f32.mrf.mxu1 }
  0xd2   :  { %v190_v14 = vadd.f32 %v189_v11, %v170_v9 }
  0xd4   :  { %v209_v12 = vpop.f32.mrf.mxu2  ;;  %v229_v13 = vpop.f32.mrf.mxu3  ;;  %275 = vtanh.f32 %v190_v14 }
  0xd5   :  { %v210_v15 = vadd.f32 %v209_v12, %v134_v10 }
  0xd7   :  { %v230_v16 = vadd.f32 %v229_v13, %v210_v15 }
  0xd9   :  { %277 = vtanh.f32 %v230_v16 }
  0xda   :  { %v276_v17 = vpop.eup %275 }
  0xdf   :  { %v278_v18 = vpop.eup %277 }
  0xe0   :  { %v236_v19 = vrot.slane %v278_v18, 4 }
  0xe2   :  { %v238_v20 = vsel %vm237_vm0, %v276_v17, %v236_v19 }
  0xe3   :  { %240 = vst [vmem:[#allocation9] sm:$0xff] %v238_v20 }
  0xe4   :  { %251 = dma.vmem_to_hbm [thread:$0]  %s247_s29, 128, %s249_s5, [#allocation6]  }
  0xe5   :  { %381 = dma.done.wait [#allocation6], 128  }
  0xe6   :  { %382 = vsyncadd [#allocation6], 4294967168 }
  0xe7   :  { %256 = vsyncpa [#allocation5], 1 }
  0xe8   :  { %257 = vsyncpa [#allocation8], 1 }
  0xe9   :  { %258 = vsyncpa [#allocation6], 1 }
  0xea   :  { %259 = vsyncmov [#allocation3] }
  0xed   :  { %s260_s6 = vpop.sfrf %259 }
  0xee   :  { %p266_p0 = scmp.ne.s32.totalorder %s260_s6, 0 }
  0xf0   :  { %264 = shalt.err (%p266_p0)  }

</bundles_post_ra>
